<compile_context>
chip_gen: v7x
topology: tpu7x:2x2x1
jax: 0.10.0
libtpu: 0.0.40
codegen_flags: <defaults>
</compile_context>

<pallas_src>
import jax
import jax.numpy as jnp
from jax.experimental import pallas as pl
from jax.experimental.pallas import tpu as pltpu


def _fused_double_q_kernel(s_ref,
                           w1_ref, b1_ref, w2_ref, b2_ref, w3_ref, b3_ref,
                           q_ref):
    """One grid step = one batch tile; both Q heads computed by 3 fused MXU matmuls."""
    s = s_ref[...]
    h = jnp.dot(s, w1_ref[...], preferred_element_type=jnp.float32) + b1_ref[...]
    h = jnp.maximum(h, 0.0)
    h = jnp.dot(h, w2_ref[...], preferred_element_type=jnp.float32) + b2_ref[...]
    h = jnp.maximum(h, 0.0)
    q = jnp.dot(h, w3_ref[...], preferred_element_type=jnp.float32) + b3_ref[...]
    q_ref[...] = q.astype(q_ref.dtype)


def _block_diag(a, b):
    """[ia, oa], [ib, ob] -> [ia+ib, oa+ob] block-diagonal (heads stay independent)."""
    ia, oa = a.shape
    ib, ob = b.shape
    top = jnp.concatenate([a, jnp.zeros((ia, ob), a.dtype)], axis=1)
    bot = jnp.concatenate([jnp.zeros((ib, oa), b.dtype), b], axis=1)
    return jnp.concatenate([top, bot], axis=0)


def _fuse_double_q_params(params_q1, params_q2, out_pad):
    """Fuse the two heads' params into one wide MLP. Output width padded to `out_pad`."""
    (w1a, b1a), (w2a, b2a), (w3a, b3a) = params_q1
    (w1b, b1b), (w2b, b2b), (w3b, b3b) = params_q2
    w1 = jnp.concatenate([w1a, w1b], axis=1)
    b1 = jnp.concatenate([b1a, b1b], axis=1)
    w2 = _block_diag(w2a, w2b)
    b2 = jnp.concatenate([b2a, b2b], axis=1)
    w3 = _block_diag(w3a, w3b)
    b3 = jnp.concatenate([b3a, b3b], axis=1)
    pad = out_pad - w3.shape[1]
    if pad > 0:  # zero columns -> padded output lanes are exactly 0, sliced off in wrapper
        w3 = jnp.pad(w3, ((0, 0), (0, pad)))
        b3 = jnp.pad(b3, ((0, 0), (0, pad)))
    return w1, b1, w2, b2, w3, b3


def double_q_forward(s, params_q1, params_q2, *, block_b=1024):
    """params_qX = [(W1, b1), (W2, b2), (W3, b3)] with W as [in, out], b as [1, out].

    Returns (q1, q2) each of shape [B, action_dim], matching Double_Q_Net.forward.
    """
    B, sd = s.shape
    action_dim = params_q1[-1][0].shape[1]
    out_w = 2 * action_dim
    out_pad = -(-out_w // 128) * 128  # lane-dense (unmasked) output stores

    w1, b1, w2, b2, w3, b3 = _fuse_double_q_params(params_q1, params_q2, out_pad)
    weights = (w1, b1, w2, b2, w3, b3)

    # Batch tile: whole problem in one step for tiny B, otherwise tile rows (multiple of 8).
    tb = B if B <= block_b else block_b
    grid = (pl.cdiv(B, tb),)

    def resident_spec(arr):
        # Same block every grid step -> weights stay resident in VMEM (no re-fetch).
        return pl.BlockSpec(arr.shape, lambda i: (0, 0))

    in_specs = [pl.BlockSpec((tb, sd), lambda i: (i, 0))]
    in_specs += [resident_spec(a) for a in weights]
    out_spec = pl.BlockSpec((tb, out_pad), lambda i: (i, 0))

    flops = 2 * B * (w1.shape[0] * w1.shape[1]
                     + w2.shape[0] * w2.shape[1]
                     + w3.shape[0] * w3.shape[1])
    bytes_accessed = 4 * (s.size + B * out_pad + sum(a.size for a in weights))

    fn = pl.pallas_call(
        _fused_double_q_kernel,
        out_shape=jax.ShapeDtypeStruct((B, out_pad), jnp.float32),
        grid=grid,
        in_specs=in_specs,
        out_specs=out_spec,
        compiler_params=pltpu.CompilerParams(
            # Batch tiles are independent -> megacore/2-TC sharding on v7x, harmless elsewhere.
            dimension_semantics=("parallel",),
            # Explicit, fits comfortably within v5e/v6e/v7x scoped VMEM.
            vmem_limit_bytes=32 * 1024 * 1024,
        ),
        cost_estimate=pl.CostEstimate(
            flops=int(flops), transcendentals=0, bytes_accessed=int(bytes_accessed)),
    )
    q = fn(s, *weights)
    return q[:, :action_dim], q[:, action_dim:out_w]


def init_mlp_params(key, layer_shape):
    """PyTorch-Linear-style init U(-1/sqrt(fan_in), 1/sqrt(fan_in)); W as [in, out], b as [1, out]."""
    params = []
    for j in range(len(layer_shape) - 1):
        fan_in, fan_out = layer_shape[j], layer_shape[j + 1]
        key, kw, kb = jax.random.split(key, 3)
        bound = 1.0 / jnp.sqrt(jnp.float32(fan_in))
        w = jax.random.uniform(kw, (fan_in, fan_out), jnp.float32, -bound, bound)
        b = jax.random.uniform(kb, (1, fan_out), jnp.float32, -bound, bound)
        params.append((w, b))
    return params


def reference_forward(s, params):
    h = s
    n = len(params)
    for j, (w, b) in enumerate(params):
        h = h @ w + b
        if j < n - 1:
            h = jnp.maximum(h, 0.0)
    return h


if __name__ == "__main__":
    # Shapes consistent with Double_Q_Net(state_dim, action_dim, hid_shape)
    state_dim, action_dim = 8, 4
    hid_shape = (32, 32)
    batch = 2

    layer_shape = [state_dim] + list(hid_shape) + [action_dim]

    root = jax.random.PRNGKey(0)
    k_s, k_q1, k_q2 = jax.random.split(root, 3)

    s = jax.random.normal(k_s, (batch, state_dim), jnp.float32)
    params_q1 = init_mlp_params(k_q1, layer_shape)
    params_q2 = init_mlp_params(k_q2, layer_shape)

    q1, q2 = double_q_forward(s, params_q1, params_q2)
    jax.block_until_ready((q1, q2))

    # Sanity check against a pure-JAX reference
    q1_ref = reference_forward(s, params_q1)
    q2_ref = reference_forward(s, params_q2)
    assert q1.shape == (batch, action_dim) and q2.shape == (batch, action_dim)
    assert jnp.allclose(q1, q1_ref, atol=1e-4, rtol=1e-4)
    assert jnp.allclose(q2, q2_ref, atol=1e-4, rtol=1e-4)

    print("KERNEL_OK")
</pallas_src>

<mosaic_0001>
module attributes {stable_mosaic.version = 11 : i64} {
  func.func @_fused_double_q_kernel(%arg0: i32, %arg1: memref<2x8xf32, #tpu.memory_space<vmem>>, %arg2: memref<8x64xf32, #tpu.memory_space<vmem>>, %arg3: memref<1x64xf32, #tpu.memory_space<vmem>>, %arg4: memref<64x64xf32, #tpu.memory_space<vmem>>, %arg5: memref<1x64xf32, #tpu.memory_space<vmem>>, %arg6: memref<64x128xf32, #tpu.memory_space<vmem>>, %arg7: memref<1x128xf32, #tpu.memory_space<vmem>>, %arg8: memref<2x128xf32, #tpu.memory_space<vmem>>) attributes {dimension_semantics = [#tpu.dimension_semantics<parallel>], iteration_bounds = array<i64: 1>, scalar_prefetch = 0 : i64, scratch_operands = 0 : i64, tpu.core_type = #tpu.core_type<tc>, window_params = [{transform_indices = @transform_0, window_bounds = array<i64: 2, 8>}, {pipeline_mode = #tpu.pipeline_mode<synchronous>, transform_indices = @transform_1, window_bounds = array<i64: 8, 64>}, {pipeline_mode = #tpu.pipeline_mode<synchronous>, transform_indices = @transform_2, window_bounds = array<i64: 1, 64>}, {pipeline_mode = #tpu.pipeline_mode<synchronous>, transform_indices = @transform_3, window_bounds = array<i64: 64, 64>}, {pipeline_mode = #tpu.pipeline_mode<synchronous>, transform_indices = @transform_4, window_bounds = array<i64: 1, 64>}, {pipeline_mode = #tpu.pipeline_mode<synchronous>, transform_indices = @transform_5, window_bounds = array<i64: 64, 128>}, {pipeline_mode = #tpu.pipeline_mode<synchronous>, transform_indices = @transform_6, window_bounds = array<i64: 1, 128>}, {transform_indices = @transform_7, window_bounds = array<i64: 2, 128>}]} {
    %c0 = arith.constant 0 : index
    %c0_0 = arith.constant 0 : index
    %0 = vector.load %arg1[%c0, %c0_0] : memref<2x8xf32, #tpu.memory_space<vmem>>, vector<2x8xf32>
    %c0_1 = arith.constant 0 : index
    %c0_2 = arith.constant 0 : index
    %1 = vector.load %arg2[%c0_1, %c0_2] : memref<8x64xf32, #tpu.memory_space<vmem>>, vector<8x64xf32>
    %cst = arith.constant dense<0.000000e+00> : vector<2x64xf32>
    %2 = tpu.matmul %0, %1, %cst {dimension_numbers = #tpu.dot_dimension_numbers<[1], [0], [0], [1], [0, 0, 1, 1], [], []>} : vector<2x8xf32>, vector<8x64xf32>, vector<2x64xf32> -> vector<2x64xf32>
    %c0_3 = arith.constant 0 : index
    %c0_4 = arith.constant 0 : index
    %3 = vector.load %arg3[%c0_3, %c0_4] : memref<1x64xf32, #tpu.memory_space<vmem>>, vector<1x64xf32>
    %4 = vector.broadcast %3 : vector<1x64xf32> to vector<2x64xf32>
    %5 = arith.addf %2, %4 : vector<2x64xf32>
    %cst_5 = arith.constant 0.000000e+00 : f32
    %6 = vector.broadcast %cst_5 : f32 to vector<2x64xf32>
    %7 = arith.maximumf %5, %6 : vector<2x64xf32>
    %c0_6 = arith.constant 0 : index
    %c0_7 = arith.constant 0 : index
    %8 = vector.load %arg4[%c0_6, %c0_7] : memref<64x64xf32, #tpu.memory_space<vmem>>, vector<64x64xf32>
    %cst_8 = arith.constant dense<0.000000e+00> : vector<2x64xf32>
    %9 = tpu.matmul %7, %8, %cst_8 {dimension_numbers = #tpu.dot_dimension_numbers<[1], [0], [0], [1], [0, 0, 1, 1], [], []>} : vector<2x64xf32>, vector<64x64xf32>, vector<2x64xf32> -> vector<2x64xf32>
    %c0_9 = arith.constant 0 : index
    %c0_10 = arith.constant 0 : index
    %10 = vector.load %arg5[%c0_9, %c0_10] : memref<1x64xf32, #tpu.memory_space<vmem>>, vector<1x64xf32>
    %11 = vector.broadcast %10 : vector<1x64xf32> to vector<2x64xf32>
    %12 = arith.addf %9, %11 : vector<2x64xf32>
    %cst_11 = arith.constant 0.000000e+00 : f32
    %13 = vector.broadcast %cst_11 : f32 to vector<2x64xf32>
    %14 = arith.maximumf %12, %13 : vector<2x64xf32>
    %c0_12 = arith.constant 0 : index
    %c0_13 = arith.constant 0 : index
    %15 = vector.load %arg6[%c0_12, %c0_13] : memref<64x128xf32, #tpu.memory_space<vmem>>, vector<64x128xf32>
    %cst_14 = arith.constant dense<0.000000e+00> : vector<2x128xf32>
    %16 = tpu.matmul %14, %15, %cst_14 {dimension_numbers = #tpu.dot_dimension_numbers<[1], [0], [0], [1], [0, 0, 1, 1], [], []>} : vector<2x64xf32>, vector<64x128xf32>, vector<2x128xf32> -> vector<2x128xf32>
    %c0_15 = arith.constant 0 : index
    %c0_16 = arith.constant 0 : index
    %17 = vector.load %arg7[%c0_15, %c0_16] : memref<1x128xf32, #tpu.memory_space<vmem>>, vector<1x128xf32>
    %18 = vector.broadcast %17 : vector<1x128xf32> to vector<2x128xf32>
    %19 = arith.addf %16, %18 : vector<2x128xf32>
    %c0_17 = arith.constant 0 : index
    %c0_18 = arith.constant 0 : index
    %20 = vector.load %arg8[%c0_17, %c0_18] : memref<2x128xf32, #tpu.memory_space<vmem>>, vector<2x128xf32>
    tpu.vector_store %arg8[%c0_17, %c0_18], %19 {strides = array<i32>} : memref<2x128xf32, #tpu.memory_space<vmem>>, vector<2x128xf32>,
    return
  }
  func.func @transform_0(%arg0: i32) -> (i32, i32) {
    %c0_i32 = arith.constant 0 : i32
    %c0_i32_0 = arith.constant 0 : i32
    return %arg0, %c0_i32 : i32, i32
  }
  func.func @transform_1(%arg0: i32) -> (i32, i32) {
    %c0_i32 = arith.constant 0 : i32
    %c0_i32_0 = arith.constant 0 : i32
    %c0_i32_1 = arith.constant 0 : i32
    return %c0_i32, %c0_i32_0 : i32, i32
  }
  func.func @transform_2(%arg0: i32) -> (i32, i32) {
    %c0_i32 = arith.constant 0 : i32
    %c0_i32_0 = arith.constant 0 : i32
    %c0_i32_1 = arith.constant 0 : i32
    return %c0_i32, %c0_i32_0 : i32, i32
  }
  func.func @transform_3(%arg0: i32) -> (i32, i32) {
    %c0_i32 = arith.constant 0 : i32
    %c0_i32_0 = arith.constant 0 : i32
    %c0_i32_1 = arith.constant 0 : i32
    return %c0_i32, %c0_i32_0 : i32, i32
  }
  func.func @transform_4(%arg0: i32) -> (i32, i32) {
    %c0_i32 = arith.constant 0 : i32
    %c0_i32_0 = arith.constant 0 : i32
    %c0_i32_1 = arith.constant 0 : i32
    return %c0_i32, %c0_i32_0 : i32, i32
  }
  func.func @transform_5(%arg0: i32) -> (i32, i32) {
    %c0_i32 = arith.constant 0 : i32
    %c0_i32_0 = arith.constant 0 : i32
    %c0_i32_1 = arith.constant 0 : i32
    return %c0_i32, %c0_i32_0 : i32, i32
  }
  func.func @transform_6(%arg0: i32) -> (i32, i32) {
    %c0_i32 = arith.constant 0 : i32
    %c0_i32_0 = arith.constant 0 : i32
    %c0_i32_1 = arith.constant 0 : i32
    return %c0_i32, %c0_i32_0 : i32, i32
  }
  func.func @transform_7(%arg0: i32) -> (i32, i32) {
    %c0_i32 = arith.constant 0 : i32
    %c0_i32_0 = arith.constant 0 : i32
    return %arg0, %c0_i32 : i32, i32
  }
}

</mosaic_0001>

<bundles_post_ra>
// kernel: tpu_custom_call.1
= control target key start
LH: loop header
LB: loop body
LE: loop exit
PB: predicated region body
PF: predicated region fallthrough
CT: control target
= control target key end

     0   :  { %12 = vsyncpa [#allocation3], 0  ;;  %s701_s0 = inlined_call_operand.hbm [shape: f32[2,8], index: 0, kind: input, shape index: {}]   ;;  %s702_s1 = inlined_call_operand.hbm [shape: f32[8,64], index: 1, kind: input, shape index: {}]   ;;  %s703_s2 = inlined_call_operand.vmem [shape: f32[1,64], index: 2, kind: input, shape index: {}]   ;;  %s704_s3 = inlined_call_operand.hbm [shape: f32[64,64], index: 3, kind: input, shape index: {}]   ;;  %s705_s4 = inlined_call_operand.vmem [shape: f32[1,64], index: 4, kind: input, shape index: {}]   ;;  %s706_s5 = inlined_call_operand.hbm [shape: f32[64,128], index: 5, kind: input, shape index: {}]   ;;  %s707_s6 = inlined_call_operand.vmem [shape: f32[1,128], index: 6, kind: input, shape index: {}]   ;;  %s708_s7 = inlined_call_operand.hbm [shape: f32[2,128], index: 7, kind: output, shape index: {}]  }
   0x1   :  { %13 = vsyncpa [#allocation6], 0 }
   0x2   :  { %14 = vsyncpa [#allocation9], 0 }
   0x3   :  { %15 = vsyncpa [#allocation4], 0  ;;  %s579_s24 = smov [#allocation5]   ;;  %s580_s26 = smov [#allocation2]  }
   0x4   :  { %s32_s25 = sshll.u32 %s579_s24, 4  ;;  %s22_s27 = sshll.u32 %s580_s26, 4  ;;  %s33_s25 = int_to_ptr.vmem [resolvable:$true] %s32_s25  ;;  %s23_s27 = int_to_ptr.vmem [resolvable:$true] %s22_s27 }
   0x5   :  { %s461_s30 = scalar_lea.hbm %s702_s1, 128 }
   0x6   :  { %p462_p0 = scmp.ne.s32.totalorder %s702_s1, %s461_s30  ;;  %p465_p1 = scmp.lt.u32.totalorder %s461_s30, %s702_s1 }
   0x8   :  { %p467_p2 = pnand %p465_p1, %p462_p0 }
   0xa   :  { %470 = shalt.err (!%p467_p2)
}
   0xb   :  { %s471_s12 = scalar_lea.vmem %s33_s25, 128  ;;  %p476_p4 = scmp.lt.s32.totalorder %s33_s25, %s33_s25 }
   0xc   :  { %p472_p3 = scmp.ne.s32.totalorder %s33_s25, %s471_s12  ;;  %p477_p5 = scmp.lt.s32.totalorder %s471_s12, %s471_s12 }
   0xe   :  { %p478_p6 = por %p477_p5, %p476_p4 }
  0x10   :  { %p479_p7 = pnand %p478_p6, %p472_p3 }
  0x12   :  { %482 = shalt.err (!%p479_p7)
}
  0x13   :  { %35 = dma.hbm_to_vmem [thread:$0]  %s702_s1, 128, %s33_s25, [#allocation6]  }
  0x14   :  { %s483_s17 = scalar_lea.hbm %s701_s0, 32 }
  0x15   :  { %p484_p8 = scmp.ne.s32.totalorder %s701_s0, %s483_s17  ;;  %p487_p9 = scmp.lt.u32.totalorder %s483_s17, %s701_s0 }
  0x17   :  { %p489_p10 = pnand %p487_p9, %p484_p8 }
  0x19   :  { %492 = shalt.err (!%p489_p10)
}
  0x1a   :  { %s493_s22 = scalar_lea.vmem %s23_s27, 32  ;;  %p498_p12 = scmp.lt.s32.totalorder %s23_s27, %s23_s27 }
  0x1b   :  { %p494_p11 = scmp.ne.s32.totalorder %s23_s27, %s493_s22  ;;  %p499_p13 = scmp.lt.s32.totalorder %s493_s22, %s493_s22 }
  0x1d   :  { %p500_p0 = por %p499_p13, %p498_p12 }
  0x1f   :  { %p501_p1 = pnand %p500_p0, %p494_p11 }
  0x21   :  { %504 = shalt.err (!%p501_p1)
}
  0x22   :  { %25 = dma.hbm_to_vmem [thread:$0]  %s701_s0, 32, %s23_s27, [#allocation3]  }
  0x23   :  { %s581_s24 = smov [#allocation7]   ;;  %s505_s29 = scalar_lea.hbm %s704_s3, 1024 }
  0x24   :  { %s43_s25 = sshll.u32 %s581_s24, 4  ;;  %p506_p2 = scmp.ne.s32.totalorder %s704_s3, %s505_s29  ;;  %s44_s25 = int_to_ptr.vmem [resolvable:$true] %s43_s25 }
  0x25   :  { %p509_p3 = scmp.lt.u32.totalorder %s505_s29, %s704_s3 }
  0x27   :  { %p511_p4 = pnand %p509_p3, %p506_p2 }
  0x29   :  { %514 = shalt.err (!%p511_p4)
}
  0x2a   :  { %s515_s11 = scalar_lea.vmem %s44_s25, 1024  ;;  %p520_p6 = scmp.lt.s32.totalorder %s44_s25, %s44_s25 }
  0x2b   :  { %p516_p5 = scmp.ne.s32.totalorder %s44_s25, %s515_s11  ;;  %p521_p7 = scmp.lt.s32.totalorder %s515_s11, %s515_s11 }
  0x2d   :  { %p522_p8 = por %p521_p7, %p520_p6 }
  0x2f   :  { %p523_p9 = pnand %p522_p8, %p516_p5 }
  0x31   :  { %526 = shalt.err (!%p523_p9)
}
  0x32   :  { %s582_s0 = smov 128   ;;  %s583_s27 = smov 8  }
  0x33   :  { %49 = dma.hbm_to_vmem [thread:$0]  %s704_s3, 1024, %s44_s25, [#allocation6], %s582_s0, %s582_s0, %s583_s27  }
  0x34   :  { %s584_s14 = smov [#allocation8]   ;;  %s527_s18 = scalar_lea.hbm %s706_s5, 1024 }
  0x35   :  { %s57_s15 = sshll.u32 %s584_s14, 4  ;;  %p528_p10 = scmp.ne.s32.totalorder %s706_s5, %s527_s18  ;;  %s58_s15 = int_to_ptr.vmem [resolvable:$true] %s57_s15 }
  0x36   :  { %p531_p11 = scmp.lt.u32.totalorder %s527_s18, %s706_s5 }
  0x38   :  { %p533_p12 = pnand %p531_p11, %p528_p10 }
  0x3a   :  { %536 = shalt.err (!%p533_p12)
}
  0x3b   :  { %s537_s1 = scalar_lea.vmem %s58_s15, 1024  ;;  %p542_p0 = scmp.lt.s32.totalorder %s58_s15, %s58_s15 }
  0x3c   :  { %p538_p13 = scmp.ne.s32.totalorder %s58_s15, %s537_s1  ;;  %p543_p1 = scmp.lt.s32.totalorder %s537_s1, %s537_s1 }
  0x3e   :  { %p544_p2 = por %p543_p1, %p542_p0 }
  0x40   :  { %p545_p3 = pnand %p544_p2, %p538_p13 }
  0x42   :  { %548 = shalt.err (!%p545_p3)
}
  0x43   :  { %63 = dma.hbm_to_vmem [thread:$0]  %s706_s5, 1024, %s58_s15, [#allocation9], %s582_s0, %s582_s0, %s583_s27  }
  0x44   :  { %571 = dma.done.wait [#allocation3], 32  }
  0x45   :  { %572 = vsyncadd [#allocation3], 4294967264 }
  0x46   :  { %573 = dma.done.wait [#allocation6], 1152  }
  0x47   :  { %574 = vsyncadd [#allocation6], 4294966144 }
  0x48   :  { %575 = dma.done.wait [#allocation9], 1024  }
  0x49   :  { %576 = vsyncadd [#allocation9], 4294966272  ;;  %v585_v0 = vmov 0.0   ;;  %vm586_vm0 = vmmov 0   ;;  %v587_v1 = vmov 0.0|0.0   ;;  %vm87_vm1 = vcmask 64512  }
  0x4a   :  { %384 = vmatprep.subr.mxu0 %v585_v0  ;;  %386 = vmatprep.mubr.msk.f32.mxu0 %vm586_vm0, %v585_v0  ;;  %v79_v2 = vld [vmem:[#allocation5] sm:$0xff]  ;;  %v78_v3 = vld [vmem:[#allocation2] sm:$0x3]  ;;  %v162_v4 = vld [vmem:[#allocation7] sm:$0xff]  ;;  %vm177_vm2 = vcmask 523264   ;;  %s588_s29 = smov [#allocation10]  }
  0x4b   :  { %427 = vmatprep.subr.bf16.mxu1 %v587_v1  ;;  %405 = vmatprep.mubr.msk.f32.mxu1 %vm586_vm0, %v585_v0  ;;  %v163_v5 = vld [vmem:[#allocation7 + $0x8] sm:$0xff]  ;;  %v164_v6 = vld [vmem:[#allocation7 + $0x10] sm:$0xff]  ;;  %v165_v7 = vld [vmem:[#allocation7 + $0x18] sm:$0xff]  ;;  %s347_s30 = sshll.u32 %s588_s29, 4  ;;  %s348_s30 = int_to_ptr.vmem [resolvable:$true] %s347_s30 }
  0x4c   :  { %385 = vmatpush3.msra.mxu0 %v79_v2  ;;  %v428_v8 = vpack.c.bf16 %v163_v5, %v162_v4  ;;  %v431_v9 = vpack.c.bf16 %v165_v7, %v164_v6  ;;  %v166_v10 = vld [vmem:[#allocation7 + $0x20] sm:$0xff]  ;;  %v167_v11 = vld [vmem:[#allocation7 + $0x28] sm:$0xff]  ;;  %v168_v13 = vld [vmem:[#allocation7 + $0x30] sm:$0xff]  ;;  %s549_s8 = scalar_lea.vmem %s348_s30, 32  ;;  %p554_p5 = scmp.lt.s32.totalorder %s348_s30, %s348_s30 }
  0x4d   :  { %387 = vmatmul.mubr.msk.f32.vlgmr.msra.gmra.mrb[0].mxu0 %vm87_vm1, %v78_v3  ;;  %439 = vmatprep.subr.bf16.mxu0 %v587_v1  ;;  %v434_v12 = vpack.c.bf16 %v167_v11, %v166_v10  ;;  %v169_v14 = vld [vmem:[#allocation7 + $0x38] sm:$0xff]  ;;  %v252_v16 = vld [vmem:[#allocation8] sm:$0xff]  ;;  %v253_v17 = vld [vmem:[#allocation8 + $0x8] sm:$0xff]  ;;  %p550_p4 = scmp.ne.s32.totalorder %s348_s30, %s549_s8  ;;  %p555_p6 = scmp.lt.s32.totalorder %s549_s8, %s549_s8 }
  0x4e   :  { %424 = vmatprep.mubr.msk.f32.mxu0 %vm586_vm0, %v585_v0  ;;  %429 = vmatpush3.bf16.msra.mxu1 %v428_v8  ;;  %v437_v15 = vpack.c.bf16 %v169_v14, %v168_v13  ;;  %v254_v18 = vld [vmem:[#allocation8 + $0x10] sm:$0xff]  ;;  %v440_v19 = vpack.c.bf16 %v253_v17, %v252_v16  ;;  %v255_v20 = vld [vmem:[#allocation8 + $0x18] sm:$0xff]  ;;  %v256_v22 = vld [vmem:[#allocation8 + $0x20] sm:$0xff] }
  0x4f   :  { %430 = vmatprep.subr.bf16.mxu1 %v587_v1  ;;  %v443_v21 = vpack.c.bf16 %v255_v20, %v254_v18  ;;  %v257_v23 = vld [vmem:[#allocation8 + $0x28] sm:$0xff]  ;;  %v358_v25 = vld [vmem:[%s703_s2] ss:$0 sm:$0xff]  ;;  %v259_v31 = vld [vmem:[#allocation8 + $0x38] sm:$0xff]  ;;  %p556_p7 = por %p555_p6, %p554_p5 }
  0x50   :  { %441 = vmatpush3.bf16.msra.mxu0 %v440_v19  ;;  %v446_v24 = vpack.c.bf16 %v257_v23, %v256_v22  ;;  %v258_v30 = vld [vmem:[#allocation8 + $0x30] sm:$0xff] }
  0x51   :  { %442 = vmatprep.subr.bf16.mxu0 %v587_v1  ;;  %v449_v32 = vpack.c.bf16 %v259_v31, %v258_v30  ;;  %v360_v33 = vld [vmem:[%s705_s4] ss:$0 sm:$0xff]  ;;  %p557_p8 = pnand %p556_p7, %p550_p4 }
  0x52   :  { %432 = vmatpush3.bf16.msra.mxu1 %v431_v9  ;;  %v362_v38 = vld [vmem:[%s707_s6] ss:$0 sm:$0xff] }
  0x53   :  { %433 = vmatprep.subr.bf16.mxu1 %v587_v1 }
  0x54   :  { %444 = vmatpush3.bf16.msra.mxu0 %v443_v21 }
  0x55   :  { %445 = vmatprep.subr.bf16.mxu0 %v587_v1 }
  0x56   :  { %435 = vmatpush3.bf16.msra.mxu1 %v434_v12 }
  0x57   :  { %436 = vmatprep.subr.bf16.mxu1 %v587_v1 }
  0x58   :  { %447 = vmatpush3.bf16.msra.mxu0 %v446_v24 }
  0x59   :  { %448 = vmatprep.subr.bf16.mxu0 %v587_v1 }
  0x5a   :  { %438 = vmatpush3.bf16.msra.mxu1 %v437_v15 }
  0x5c   :  { %450 = vmatpush3.bf16.msra.mxu0 %v449_v32 }
 0x120   :  { %v157_v26 = vpop.f32.mrb[0].mxu0 }
 0x121   :  { %v158_v27 = vadd.f32 %v358_v25, %v157_v26  ;;  %v388_v28 = vpop.f32.mrb[1].mxu0 }
 0x123   :  { %v161_v29 = vmax.f32 %v158_v27, 0.0 }
 0x125   :  { %406 = vmatmul.mubr.msk.f32.vlgmr.msra.gmra.mrb[0].mxu1 %vm177_vm2, %v161_v29 }
 0x1f8   :  { %v247_v34 = vpop.f32.mrb[0].mxu1 }
 0x1f9   :  { %v248_v35 = vadd.f32 %v360_v33, %v247_v34  ;;  %v407_v36 = vpop.f32.mrb[1].mxu1 }
 0x1fb   :  { %v251_v37 = vmax.f32 %v248_v35, 0.0 }
 0x1fd   :  { %425 = vmatmul.mubr.msk.f32.vlgmr.msra.gmra.mrb[2].mxu0 %vm177_vm2, %v251_v37 }
 0x2d0   :  { %v336_v39 = vpop.f32.mrb[2].mxu0 }
 0x2d1   :  { %v337_v40 = vadd.f32 %v362_v38, %v336_v39  ;;  %v426_v41 = vpop.f32.mrb[3].mxu0 }
 0x2d3   :  { %340 = vst [vmem:[#allocation10] sm:$0x3] %v337_v40 }
 0x2d4   :  { %560 = shalt.err (!%p557_p8)
}
 0x2d5   :  { %s561_s10 = scalar_lea.hbm %s708_s7, 32 }
 0x2d6   :  { %p562_p9 = scmp.ne.s32.totalorder %s708_s7, %s561_s10  ;;  %p565_p10 = scmp.lt.u32.totalorder %s561_s10, %s708_s7 }
 0x2d8   :  { %p567_p11 = pnand %p565_p10, %p562_p9 }
 0x2da   :  { %570 = shalt.err (!%p567_p11)
}
 0x2db   :  { %350 = dma.vmem_to_hbm [thread:$0]  %s348_s30, 32, %s708_s7, [#allocation4]  }
 0x2dc   :  { %577 = dma.done.wait [#allocation4], 32  }
 0x2dd   :  { %578 = vsyncadd [#allocation4], 4294967264 }
 0x2de   :  { %354 = vsyncpa [#allocation3], 1 }
 0x2df   :  { %355 = vsyncpa [#allocation6], 1 }
 0x2e0   :  { %356 = vsyncpa [#allocation9], 1 }
 0x2e1   :  { %357 = vsyncpa [#allocation4], 1 }

</bundles_post_ra>
